<compile_context>
chip_gen: v6e
topology: v6e:2x2x1
jax: 0.10.0
libtpu: 0.0.40
codegen_flags: <defaults>
</compile_context>

<pallas_src>
import functools

import jax
import jax.numpy as jnp
from jax.experimental import pallas as pl
from jax.experimental.pallas import tpu as pltpu

_LANE = 1024              # lane-dense minor dim (multiple of 128)
_MAX_BLOCK_ROWS = 1024    # 1024x1024 f32 tile = 4 MiB -> 16 MiB dbl-buffered in+out
_VMEM_LIMIT = 32 << 20    # explicit scoped-VMEM limit; safe on v5e/v6e/v7x


def _affine_kernel(p_ref, x_ref, o_ref):
    """out = (x + pre) * scale + post, coordinate chosen by lane parity."""
    x = x_ref[...].astype(jnp.float32)
    lane = jax.lax.broadcasted_iota(jnp.int32, (1, x.shape[-1]), 1)
    is_x = (lane & 1) == 0
    pre = jnp.where(is_x, p_ref[0], p_ref[1])
    scale = jnp.where(is_x, p_ref[2], p_ref[3])
    post = jnp.where(is_x, p_ref[4], p_ref[5])
    o_ref[...] = ((x + pre) * scale + post).astype(o_ref.dtype)


@functools.lru_cache(maxsize=None)
def _make_call(rows, block_rows, lane, dtype_name):
    dtype = jnp.dtype(dtype_name)
    return pl.pallas_call(
        _affine_kernel,
        out_shape=jax.ShapeDtypeStruct((rows, lane), dtype),
        grid_spec=pltpu.PrefetchScalarGridSpec(
            num_scalar_prefetch=0,
            grid=(pl.cdiv(rows, block_rows),),          # partial last block is masked
            in_specs=[
                pl.BlockSpec(memory_space=pltpu.SMEM),               # (6,) params
                pl.BlockSpec((block_rows, lane), lambda i: (i, 0)),  # x slab tile
            ],
            out_specs=pl.BlockSpec((block_rows, lane), lambda i: (i, 0)),
        ),
        compiler_params=pltpu.CompilerParams(
            dimension_semantics=("parallel",),
            vmem_limit_bytes=_VMEM_LIMIT,
        ),
    )


def _affine_pairs(x2, params):
    """Plain-jnp affine on an (..., 2) array — only for tiny ragged tails."""
    pre = params[0:2]
    scale = params[2:4]
    post = params[4:6]
    return ((x2.astype(jnp.float32) + pre) * scale + post).astype(x2.dtype)


@jax.jit
def _apply_affine(x, params):
    """Apply (x + pre) * scale + post with per-(x, y) scalars to x[..., 2]."""
    orig_shape = x.shape
    n = x.size
    flat = x.reshape(-1)                    # bitcast (contiguous)

    n_main = (n // _LANE) * _LANE
    if n_main == 0:
        # Tiny input (< one lane row): a kernel launch isn't worth it.
        return _affine_pairs(flat.reshape(-1, 2), params).reshape(orig_shape)

    rows = n_main // _LANE
    block_rows = min(_MAX_BLOCK_ROWS, rows)  # either full extent or (8/16,128)-aligned
    call = _make_call(rows, block_rows, _LANE, str(x.dtype))

    if n_main == n:
        # Lane-aligned fast path: reshape in/out is a bitcast; the kernel's
        # single HBM read + write is the only memory traffic.
        return call(params, flat.reshape(rows, _LANE)).reshape(orig_shape)

    # Ragged: kernel on the lane-aligned prefix, plain jnp on the <1024-element
    # tail (parity is preserved since n_main is even), then stitch.  One small
    # combine pass — far cheaper than padding + slicing the whole tensor.
    out_main = call(params, flat[:n_main].reshape(rows, _LANE)).reshape(-1)
    out_tail = _affine_pairs(flat[n_main:].reshape(-1, 2), params).reshape(-1)
    return jnp.concatenate([out_main, out_tail]).reshape(orig_shape)


class NormalizeLoc:
    """JAX/Pallas port of Normalize_loc."""

    def __init__(self, loc_x_mean, loc_y_mean, loc_x_std, loc_y_std):
        self.loc_mean = jnp.asarray([loc_x_mean, loc_y_mean], dtype=jnp.float32)
        self.loc_std = jnp.asarray([loc_x_std, loc_y_std], dtype=jnp.float32)
        zeros = jnp.zeros((2,), jnp.float32)
        # norm:   out = (x - mean) * (1/std) + 0   (reciprocal precomputed, <=1 ulp)
        self._params_norm = jnp.concatenate(
            [-self.loc_mean, 1.0 / self.loc_std, zeros])
        # denorm: out = (x + 0) * std + mean
        self._params_denorm = jnp.concatenate(
            [zeros, self.loc_std, self.loc_mean])

    def __call__(self, x, mode):
        if mode == "norm":
            params = self._params_norm
        elif mode == "denorm":
            params = self._params_denorm
        else:
            return x  # matches PyTorch: passthrough for any other mode
        x = jnp.asarray(x)  # keep native dtype (f32 or bf16)
        assert x.shape[-1] == 2, "Normalize_loc expects last axis = 2 (x, y)"
        return _apply_affine(x, params)


if __name__ == "__main__":
    key = jax.random.PRNGKey(0)
    k1, k2, k3 = jax.random.split(key, 3)

    # Deterministic "dataset statistics" (what __init__ would receive).
    loc_x_mean, loc_y_mean = 116.40, 39.90
    loc_x_std, loc_y_std = 0.25, 0.15
    module = NormalizeLoc(loc_x_mean, loc_y_mean, loc_x_std, loc_y_std)
    mean = jnp.asarray([loc_x_mean, loc_y_mean], jnp.float32)
    std = jnp.asarray([loc_x_std, loc_y_std], jnp.float32)

    # 1) Lane-aligned case: [batch=4, seq=128, 2] -> n = 1024, Pallas fast path.
    x = jax.random.normal(k1, (4, 128, 2), dtype=jnp.float32) * std + mean
    x_norm = module(x, "norm")
    x_denorm = module(x_norm, "denorm")
    jax.block_until_ready((x_norm, x_denorm))

    ref_norm = (x - mean) / std
    ref_denorm = ref_norm * std + mean
    assert jnp.allclose(x_norm, ref_norm, atol=1e-5, rtol=1e-5)
    assert jnp.allclose(x_denorm, ref_denorm, atol=1e-5, rtol=1e-5)
    assert jnp.allclose(x_denorm, x, atol=1e-4, rtol=1e-5)

    # 2) Ragged case: [3, 200, 2] -> n = 1200 (kernel on 1024-elem prefix + jnp tail).
    xr = jax.random.normal(k2, (3, 200, 2), dtype=jnp.float32) * std + mean
    xr_norm = module(xr, "norm")
    jax.block_until_ready(xr_norm)
    assert jnp.allclose(xr_norm, (xr - mean) / std, atol=1e-5, rtol=1e-5)

    # 3) Native bf16 path (no f32 up-cast of the HBM traffic).
    xb = (jax.random.normal(k3, (4, 128, 2), dtype=jnp.float32) * std + mean)
    xb = xb.astype(jnp.bfloat16)
    xb_norm = module(xb, "norm")
    jax.block_until_ready(xb_norm)
    refb = ((xb.astype(jnp.float32) - mean) / std).astype(jnp.bfloat16)
    assert jnp.allclose(xb_norm.astype(jnp.float32), refb.astype(jnp.float32),
                        atol=5e-2, rtol=5e-2)

    print("KERNEL_OK")
</pallas_src>

<mosaic_0001>
module attributes {stable_mosaic.version = 11 : i64} {
  func.func @_affine_kernel(%arg0: i32, %arg1: memref<6xf32, #tpu.memory_space<smem>>, %arg2: memref<1x1024xf32, #tpu.memory_space<vmem>>, %arg3: memref<1x1024xf32, #tpu.memory_space<vmem>>) attributes {dimension_semantics = [#tpu.dimension_semantics<parallel>], iteration_bounds = array<i64: 1>, scalar_prefetch = 0 : i64, scratch_operands = 0 : i64, tpu.core_type = #tpu.core_type<tc>, window_params = [{transform_indices = @transform_0, window_bounds = array<i64: 6>}, {transform_indices = @transform_1, window_bounds = array<i64: 1, 1024>}, {transform_indices = @transform_2, window_bounds = array<i64: 1, 1024>}]} {
    %c0 = arith.constant 0 : index
    %c0_0 = arith.constant 0 : index
    %0 = vector.load %arg2[%c0, %c0_0] : memref<1x1024xf32, #tpu.memory_space<vmem>>, vector<1x1024xf32>
    %1 = tpu.iota {dimensions = array<i32: 1>} : vector<1x1024xi32>
    %c1_i32 = arith.constant 1 : i32
    %2 = vector.broadcast %c1_i32 : i32 to vector<1x1024xi32>
    %3 = arith.andi %1, %2 : vector<1x1024xi32>
    %c0_i32 = arith.constant 0 : i32
    %4 = vector.broadcast %c0_i32 : i32 to vector<1x1024xi32>
    %5 = arith.cmpi eq, %3, %4 : vector<1x1024xi32>
    %c0_1 = arith.constant 0 : index
    %6 = memref.load %arg1[%c0_1] : memref<6xf32, #tpu.memory_space<smem>>
    %c1 = arith.constant 1 : index
    %7 = memref.load %arg1[%c1] : memref<6xf32, #tpu.memory_space<smem>>
    %8 = vector.broadcast %6 : f32 to vector<1x1024xf32>
    %9 = vector.broadcast %7 : f32 to vector<1x1024xf32>
    %10 = arith.select %5, %8, %9 : vector<1x1024xi1>, vector<1x1024xf32>
    %c2 = arith.constant 2 : index
    %11 = memref.load %arg1[%c2] : memref<6xf32, #tpu.memory_space<smem>>
    %c3 = arith.constant 3 : index
    %12 = memref.load %arg1[%c3] : memref<6xf32, #tpu.memory_space<smem>>
    %13 = vector.broadcast %11 : f32 to vector<1x1024xf32>
    %14 = vector.broadcast %12 : f32 to vector<1x1024xf32>
    %15 = arith.select %5, %13, %14 : vector<1x1024xi1>, vector<1x1024xf32>
    %c4 = arith.constant 4 : index
    %16 = memref.load %arg1[%c4] : memref<6xf32, #tpu.memory_space<smem>>
    %c5 = arith.constant 5 : index
    %17 = memref.load %arg1[%c5] : memref<6xf32, #tpu.memory_space<smem>>
    %18 = vector.broadcast %16 : f32 to vector<1x1024xf32>
    %19 = vector.broadcast %17 : f32 to vector<1x1024xf32>
    %20 = arith.select %5, %18, %19 : vector<1x1024xi1>, vector<1x1024xf32>
    %21 = arith.addf %0, %10 : vector<1x1024xf32>
    %22 = arith.mulf %21, %15 : vector<1x1024xf32>
    %23 = arith.addf %22, %20 : vector<1x1024xf32>
    %c0_2 = arith.constant 0 : index
    %c0_3 = arith.constant 0 : index
    %24 = vector.load %arg3[%c0_2, %c0_3] : memref<1x1024xf32, #tpu.memory_space<vmem>>, vector<1x1024xf32>
    tpu.vector_store %arg3[%c0_2, %c0_3], %23 {strides = array<i32>} : memref<1x1024xf32, #tpu.memory_space<vmem>>, vector<1x1024xf32>,
    return
  }
  func.func @transform_0(%arg0: i32) -> i32 {
    %c0_i32 = arith.constant 0 : i32
    %c0_i32_0 = arith.constant 0 : i32
    return %c0_i32 : i32
  }
  func.func @transform_1(%arg0: i32) -> (i32, i32) {
    %c0_i32 = arith.constant 0 : i32
    %c0_i32_0 = arith.constant 0 : i32
    return %arg0, %c0_i32 : i32, i32
  }
  func.func @transform_2(%arg0: i32) -> (i32, i32) {
    %c0_i32 = arith.constant 0 : i32
    %c0_i32_0 = arith.constant 0 : i32
    return %arg0, %c0_i32 : i32, i32
  }
}

</mosaic_0001>

<bundles_post_ra>
// kernel: _apply_affine.1
= control target key start
LH: loop header
LB: loop body
LE: loop exit
PB: predicated region body
PF: predicated region fallthrough
CT: control target
= control target key end

     0   :  { %7 = vsyncpa [#allocation3], 0  ;;  %s411_s0 = inlined_call_operand.vmem [shape: f32[6], index: 0, kind: input, shape index: {}]   ;;  %s412_s1 = inlined_call_operand.vmem [shape: f32[1,1024], index: 1, kind: input, shape index: {}]   ;;  %s413_s2 = inlined_call_operand.vmem [shape: f32[1,1024], index: 2, kind: output, shape index: {}]  }
   0x1   :  { %s14_s11 = sshll.u32 %s411_s0, 4  ;;  %s15_s11 = int_to_ptr.vmem [resolvable:$true] %s14_s11 }
   0x2   :  { %s276_s12 = scalar_lea.vmem %s15_s11, 16  ;;  %p281_p1 = scmp.lt.s32.totalorder %s15_s11, %s15_s11 }
   0x3   :  { %p277_p0 = scmp.ne.s32.totalorder %s15_s11, %s276_s12  ;;  %p282_p2 = scmp.lt.s32.totalorder %s276_s12, %s276_s12 }
   0x5   :  { %p283_p3 = por %p282_p2, %p281_p1 }
   0x7   :  { %p284_p4 = pnand %p283_p3, %p277_p0 }
   0x9   :  { %287 = shalt.err (!%p284_p4)
}
   0xa   :  { %s290_s13 = smov [#allocation2]  }
   0xb   :  { %17 = dma.vmem_to_smem %s15_s11, 16, %s290_s13, [#allocation3]  }
   0xc   :  { %288 = dma.done.wait [#allocation3], 16  }
   0xd   :  { %289 = vsyncadd [#allocation3], 4294967280 }
   0xe   :  { %23 = sfence }
   0xf   :  { %v25_v0 = vlaneseq  ;;  %s310_s14 = sld [smem:[#allocation2]]  ;;  %v291_v1 = vmov 1966171168   ;;  %v24_v26 = vld [vmem:[%s412_s1] sm:$0xff] }
  0x10   :  { %s312_s15 = sld [smem:[#allocation2 + $0x1]]  ;;  %v314_v2 = vunpack.c.l.s4 %v291_v1 }
  0x11   :  { %v26_v3 = vand.u32 127, %v25_v0  ;;  %s316_s0 = sld [smem:[#allocation2 + $0x2]]  ;;  %v102_v5 = vshrl.u32 %v25_v0, 7 }
  0x12   :  { %s318_s16 = sld [smem:[#allocation2 + $0x3]]  ;;  %v100_v4 = vunpack.c.0.s8 %v314_v2 }
  0x13   :  { %v27_v6 = vadd.s32 128, %v26_v3  ;;  %v28_v7 = vadd.s32 256, %v26_v3  ;;  %v29_v8 = vadd.s32 384, %v26_v3  ;;  %v30_v9 = vadd.s32 512, %v26_v3  ;;  %s272_s17 = sld [smem:[#allocation2 + $0x4]] }
  0x14   :  { %v31_v10 = vadd.s32 640, %v26_v3  ;;  %v32_v11 = vadd.s32 768, %v26_v3  ;;  %v33_v12 = vadd.s32 896, %v26_v3  ;;  %v34_v13 = vand.u32 1, %v26_v3  ;;  %s273_s18 = sld [smem:[#allocation2 + $0x5]] }
  0x15   :  { %v35_v14 = vand.u32 1, %v27_v6  ;;  %v36_v15 = vand.u32 1, %v28_v7  ;;  %v37_v16 = vand.u32 1, %v29_v8  ;;  %v38_v17 = vand.u32 1, %v30_v9 }
  0x16   :  { %v39_v18 = vand.u32 1, %v31_v10  ;;  %v40_v19 = vand.u32 1, %v32_v11  ;;  %v41_v20 = vand.u32 1, %v33_v12  ;;  %vm321_vm0 = vcmp.eq.s32.totalorder %v34_v13, 0 }
  0x17   :  { %vm325_vm1 = vcmp.eq.s32.totalorder %v35_v14, 0  ;;  %vm329_vm2 = vcmp.eq.s32.totalorder %v36_v15, 0  ;;  %vm333_vm3 = vcmp.eq.s32.totalorder %v37_v16, 0  ;;  %vm337_vm4 = vcmp.eq.s32.totalorder %v38_v17, 0 }
  0x18   :  { %vm341_vm5 = vcmp.eq.s32.totalorder %v39_v18, 0  ;;  %vm345_vm6 = vcmp.eq.s32.totalorder %v40_v19, 0  ;;  %vm349_vm7 = vcmp.eq.s32.totalorder %v41_v20, 0  ;;  %v52_v29 = vstv %s310_s14 }
  0x19   :  { %v53_v30 = vstv %s312_s15  ;;  %v64_v31 = vstv %s316_s0  ;;  %v65_v32 = vstv %s318_s16  ;;  %v76_v33 = vstv %s272_s17 }
  0x1a   :  { %v54_v34 = vsel %vm321_vm0, %v52_v29, %v53_v30  ;;  %v55_v35 = vsel %vm325_vm1, %v52_v29, %v53_v30  ;;  %v56_v36 = vsel %vm329_vm2, %v52_v29, %v53_v30  ;;  %v57_v37 = vsel %vm333_vm3, %v52_v29, %v53_v30 }
  0x1b   :  { %v58_v38 = vsel %vm337_vm4, %v52_v29, %v53_v30  ;;  %v59_v39 = vsel %vm341_vm5, %v52_v29, %v53_v30  ;;  %v60_v40 = vsel %vm345_vm6, %v52_v29, %v53_v30  ;;  %v61_v41 = vsel %vm349_vm7, %v52_v29, %v53_v30 }
  0x1c   :  { %v66_v42 = vsel %vm321_vm0, %v64_v31, %v65_v32  ;;  %v67_v43 = vsel %vm325_vm1, %v64_v31, %v65_v32  ;;  %v68_v44 = vsel %vm329_vm2, %v64_v31, %v65_v32  ;;  %v69_v45 = vsel %vm333_vm3, %v64_v31, %v65_v32 }
  0x1d   :  { %v70_v46 = vsel %vm337_vm4, %v64_v31, %v65_v32  ;;  %v71_v47 = vsel %vm341_vm5, %v64_v31, %v65_v32  ;;  %v72_v48 = vsel %vm345_vm6, %v64_v31, %v65_v32  ;;  %v73_v49 = vsel %vm349_vm7, %v64_v31, %v65_v32 }
  0x1e   :  { %v77_v50 = vstv %s273_s18  ;;  %v94_v51 = vcombine.low %v54_v34, %v55_v35  ;;  %v95_v52 = vcombine.low %v56_v36, %v57_v37  ;;  %v96_v53 = vcombine.low %v58_v38, %v59_v39 }
  0x1f   :  { %v78_v54 = vsel %vm321_vm0, %v76_v33, %v77_v50  ;;  %v79_v55 = vsel %vm325_vm1, %v76_v33, %v77_v50  ;;  %v80_v56 = vsel %vm329_vm2, %v76_v33, %v77_v50  ;;  %v81_v57 = vsel %vm333_vm3, %v76_v33, %v77_v50 }
  0x20   :  { %v82_v58 = vsel %vm337_vm4, %v76_v33, %v77_v50  ;;  %v83_v59 = vsel %vm341_vm5, %v76_v33, %v77_v50  ;;  %v84_v60 = vsel %vm345_vm6, %v76_v33, %v77_v50  ;;  %v85_v61 = vsel %vm349_vm7, %v76_v33, %v77_v50 }
  0x21   :  { %v97_v62 = vcombine.low %v60_v40, %v61_v41  ;;  %v103_v63 = vsub.s32 %v100_v4, %v102_v5  ;;  %v153_v0 = vcombine.low %v66_v42, %v67_v43  ;;  %v154_v1 = vcombine.low %v68_v44, %v69_v45 }
  0x22   :  { %v155_v2 = vcombine.low %v70_v46, %v71_v47  ;;  %v156_v3 = vcombine.low %v72_v48, %v73_v49  ;;  %v212_v6 = vcombine.low %v78_v54, %v79_v55  ;;  %v213_v7 = vcombine.low %v80_v56, %v81_v57 }
  0x23   :  { %v104_v8 = vrot.slane %v94_v51, %v103_v63  ;;  %v111_v9 = vrot.slane %v95_v52, %v103_v63  ;;  %v118_v10 = vrot.slane %v96_v53, %v103_v63  ;;  %v125_v11 = vrot.slane %v97_v62, %v103_v63 }
  0x24   :  { %v163_v12 = vrot.slane %v153_v0, %v103_v63  ;;  %v170_v13 = vrot.slane %v154_v1, %v103_v63  ;;  %v177_v14 = vrot.slane %v155_v2, %v103_v63  ;;  %v184_v15 = vrot.slane %v156_v3, %v103_v63 }
  0x25   :  { %v126_v16 = vcombine.low %v104_v8, %v111_v9  ;;  %v127_v17 = vcombine.low %v118_v10, %v125_v11  ;;  %v214_v18 = vcombine.low %v82_v58, %v83_v59  ;;  %v215_v19 = vcombine.low %v84_v60, %v85_v61 }
  0x26   :  { %v185_v20 = vcombine.low %v163_v12, %v170_v13  ;;  %v186_v4 = vcombine.low %v177_v14, %v184_v15  ;;  %v222_v5 = vrot.slane %v212_v6, %v103_v63  ;;  %v229_v21 = vrot.slane %v213_v7, %v103_v63 }
  0x27   :  { %v134_v22 = vrot.slane %v126_v16, %v103_v63  ;;  %v141_v23 = vrot.slane %v127_v17, %v103_v63  ;;  %v236_v24 = vrot.slane %v214_v18, %v103_v63  ;;  %v243_v25 = vrot.slane %v215_v19, %v103_v63 }
  0x28   :  { %v193_v27 = vrot.slane %v185_v20, %v103_v63  ;;  %v200_v28 = vrot.slane %v186_v4, %v103_v63  ;;  %v244_v29 = vcombine.low %v222_v5, %v229_v21 }
  0x29   :  { %v142_v30 = vcombine.low %v134_v22, %v141_v23  ;;  %v245_v31 = vcombine.low %v236_v24, %v243_v25 }
  0x2a   :  { %v201_v32 = vcombine.low %v193_v27, %v200_v28  ;;  %v252_v33 = vrot.slane %v244_v29, %v103_v63 }
  0x2b   :  { %v144_v34 = vadd.f32 %v142_v30, %v24_v26  ;;  %v259_v35 = vrot.slane %v245_v31, %v103_v63 }
  0x2d   :  { %v203_v36 = vmul.f32 %v201_v32, %v144_v34  ;;  %v260_v37 = vcombine.low %v252_v33, %v259_v35 }
  0x2f   :  { %v262_v38 = vadd.f32 %v260_v37, %v203_v36 }
  0x31   :  { %263 = vst [vmem:[%s413_s2] sm:$0xff] %v262_v38 }
  0x32   :  { %268 = vsyncpa [#allocation3], 1 }

</bundles_post_ra>
